<compile_context>
chip_gen: v5e
topology: v5e:2x2
jax: 0.10.0
libtpu: 0.0.40
codegen_flags: <defaults>
</compile_context>

<pallas_src>
import functools

import jax
import jax.numpy as jnp
import numpy as np
from jax.experimental import pallas as pl
from jax.experimental.pallas import tpu as pltpu


def _round_up(x, m):
    return ((x + m - 1) // m) * m


def _classifier_kernel(x_ref, w_ref, b_ref, o_ref, acc_ref):
    # x_ref: (tm, tk)   w_ref: (tk, tn)   b_ref: (1, tn)
    # o_ref: (tm, tn)   acc_ref: (tm, tn) f32 scratch (resident across K steps)
    k = pl.program_id(2)

    @pl.when(k == 0)
    def _init():
        acc_ref[...] = jnp.zeros_like(acc_ref)

    acc_ref[...] += jnp.dot(
        x_ref[...], w_ref[...], preferred_element_type=jnp.float32
    )

    @pl.when(k == pl.num_programs(2) - 1)
    def _finalize():
        # Bias add + cast in the epilogue only (f32 VPU math, hidden under
        # the MXU drain), then a lane-dense store.
        logits = acc_ref[...] + b_ref[...].astype(jnp.float32)
        o_ref[...] = logits.astype(o_ref.dtype)


@functools.partial(jax.jit, static_argnames=("tm", "tn", "tk"))
def classifier_forward(x, weight, bias, *, tm=256, tn=256, tk=512):
    """logits = x @ weight.T + bias  (semantics of nn.Linear forward).

    x:      (B, H)
    weight: (C, H)   -- PyTorch nn.Linear layout
    bias:   (C,)
    returns (B, C)
    """
    B, H = x.shape
    C, H2 = weight.shape
    assert H == H2, "weight hidden dim must match input hidden dim"

    out_dtype = x.dtype

    # Pre-transpose weight once (outside the kernel) -> (H, C) = (K, N).
    w_t = weight.T

    # Tile sizes: lane-dense (multiples of 128) on N and K; sublane-aligned on M.
    tm = min(tm, _round_up(B, 8))
    tn = min(tn, _round_up(C, 128))
    tk = min(tk, _round_up(H, 128))

    Bp = _round_up(B, tm)
    Hp = _round_up(H, tk)
    Cp = _round_up(C, tn)

    # Zero-pad operands to tile multiples (zero columns/rows contribute 0 to the
    # matmul; padded output columns are sliced away below).
    x_p = jnp.pad(x, ((0, Bp - B), (0, Hp - H)))
    w_p = jnp.pad(w_t, ((0, Hp - H), (0, Cp - C)))
    b_p = jnp.pad(bias.reshape(1, C), ((0, 0), (0, Cp - C)))

    grid = (Bp // tm, Cp // tn, Hp // tk)

    itemsize = jnp.dtype(x.dtype).itemsize
    flops = 2 * Bp * Cp * Hp
    bytes_accessed = (
        Bp * Hp * itemsize
        + Hp * Cp * jnp.dtype(weight.dtype).itemsize
        + Cp * jnp.dtype(bias.dtype).itemsize
        + Bp * Cp * jnp.dtype(out_dtype).itemsize
    )

    # Double-buffered input tiles + output tile + f32 accumulator, with headroom.
    footprint = (
        2 * (tm * tk + tk * tn + tn) * itemsize
        + 2 * tm * tn * jnp.dtype(out_dtype).itemsize
        + tm * tn * 4
    )
    vmem_limit = int(min(max(4 * footprint, 8 << 20), 32 << 20))

    out_p = pl.pallas_call(
        _classifier_kernel,
        out_shape=jax.ShapeDtypeStruct((Bp, Cp), out_dtype),
        grid_spec=pltpu.PrefetchScalarGridSpec(
            num_scalar_prefetch=0,
            grid=grid,
            in_specs=[
                pl.BlockSpec((tm, tk), lambda i, j, k: (i, k)),   # x
                pl.BlockSpec((tk, tn), lambda i, j, k: (k, j)),   # W^T (K, N)
                pl.BlockSpec((1, tn), lambda i, j, k: (0, j)),    # bias (N only)
            ],
            out_specs=pl.BlockSpec((tm, tn), lambda i, j, k: (i, j)),
            scratch_shapes=[pltpu.VMEM((tm, tn), jnp.float32)],
        ),
        compiler_params=pltpu.CompilerParams(
            dimension_semantics=("parallel", "parallel", "arbitrary"),
            vmem_limit_bytes=vmem_limit,
        ),
        cost_estimate=pl.CostEstimate(
            flops=flops, transcendentals=0, bytes_accessed=bytes_accessed
        ),
    )(x_p, w_p, b_p)

    return out_p[:B, :C]


def init_classifier_params(key, hidden_dim, num_class, dtype=jnp.float32):
    """Deterministic params matching the PyTorch __init__:
       - weight: xavier_uniform (gain=1), shape (num_class, hidden_dim)
       - bias:   zeros, shape (num_class,)
    """
    fan_in, fan_out = hidden_dim, num_class
    limit = float(np.sqrt(6.0 / (fan_in + fan_out)))
    weight = jax.random.uniform(
        key, (num_class, hidden_dim), dtype=dtype, minval=-limit, maxval=limit
    )
    bias = jnp.zeros((num_class,), dtype=dtype)
    return weight, bias


if __name__ == "__main__":
    key = jax.random.PRNGKey(0)

    # Case 1: module-sized small shapes (single tile after padding).
    hidden_dim, num_class, batch = 32, 8, 8
    k_w, k_x, k_b2, k_w2, k_x2 = jax.random.split(key, 5)
    weight, bias = init_classifier_params(k_w, hidden_dim, num_class)
    x = jax.random.normal(k_x, (batch, hidden_dim), dtype=jnp.float32)

    logits = jax.block_until_ready(classifier_forward(x, weight, bias))
    ref = x @ weight.T + bias
    np.testing.assert_allclose(
        np.asarray(logits), np.asarray(ref), rtol=1e-5, atol=1e-5
    )

    # Case 2: shapes that exercise the multi-step (M, N, K) tiled reduction path
    # (grid = (3, 2, 3) with these tile sizes), including padding + bias.
    hidden_dim2, num_class2, batch2 = 384, 130, 40
    weight2, _ = init_classifier_params(k_w2, hidden_dim2, num_class2)
    bias2 = 0.1 * jax.random.normal(k_b2, (num_class2,), dtype=jnp.float32)
    x2 = jax.random.normal(k_x2, (batch2, hidden_dim2), dtype=jnp.float32)

    logits2 = jax.block_until_ready(
        classifier_forward(x2, weight2, bias2, tm=16, tn=128, tk=128)
    )
    ref2 = x2 @ weight2.T + bias2
    np.testing.assert_allclose(
        np.asarray(logits2), np.asarray(ref2), rtol=1e-5, atol=1e-5
    )

    print("KERNEL_OK")
</pallas_src>

<mosaic_0001>
module attributes {stable_mosaic.version = 11 : i64} {
  func.func @_classifier_kernel(%arg0: i32, %arg1: i32, %arg2: i32, %arg3: memref<8x128xf32, #tpu.memory_space<vmem>>, %arg4: memref<128x128xf32, #tpu.memory_space<vmem>>, %arg5: memref<1x128xf32, #tpu.memory_space<vmem>>, %arg6: memref<8x128xf32, #tpu.memory_space<vmem>>, %arg7: memref<8x128xf32, #tpu.memory_space<vmem>>) attributes {dimension_semantics = [#tpu.dimension_semantics<parallel>, #tpu.dimension_semantics<parallel>, #tpu.dimension_semantics<arbitrary>], iteration_bounds = array<i64: 1, 1, 1>, scalar_prefetch = 0 : i64, scratch_operands = 1 : i64, tpu.core_type = #tpu.core_type<tc>, window_params = [{transform_indices = @transform_0, window_bounds = array<i64: 8, 128>}, {transform_indices = @transform_1, window_bounds = array<i64: 128, 128>}, {transform_indices = @transform_2, window_bounds = array<i64: 1, 128>}, {transform_indices = @transform_3, window_bounds = array<i64: 8, 128>}]} {
    %c0_i32 = arith.constant 0 : i32
    %0 = arith.cmpi eq, %arg2, %c0_i32 : i32
    %1 = arith.extui %0 : i1 to i32
    %c0_i32_0 = arith.constant 0 : i32
    %2 = arith.cmpi ne, %1, %c0_i32_0 : i32
    scf.if %2 {
      %cst_10 = arith.constant 0.000000e+00 : f32
      %12 = vector.broadcast %cst_10 : f32 to vector<8x128xf32>
      %c0_11 = arith.constant 0 : index
      %c0_12 = arith.constant 0 : index
      %13 = vector.load %arg7[%c0_11, %c0_12] : memref<8x128xf32, #tpu.memory_space<vmem>>, vector<8x128xf32>
      tpu.vector_store %arg7[%c0_11, %c0_12], %12 {strides = array<i32>} : memref<8x128xf32, #tpu.memory_space<vmem>>, vector<8x128xf32>,
    } else {
    }
    %c0 = arith.constant 0 : index
    %c0_1 = arith.constant 0 : index
    %3 = vector.load %arg7[%c0, %c0_1] : memref<8x128xf32, #tpu.memory_space<vmem>>, vector<8x128xf32>
    %c0_2 = arith.constant 0 : index
    %c0_3 = arith.constant 0 : index
    %4 = vector.load %arg3[%c0_2, %c0_3] : memref<8x128xf32, #tpu.memory_space<vmem>>, vector<8x128xf32>
    %c0_4 = arith.constant 0 : index
    %c0_5 = arith.constant 0 : index
    %5 = vector.load %arg4[%c0_4, %c0_5] : memref<128x128xf32, #tpu.memory_space<vmem>>, vector<128x128xf32>
    %cst = arith.constant dense<0.000000e+00> : vector<8x128xf32>
    %6 = tpu.matmul %4, %5, %cst {dimension_numbers = #tpu.dot_dimension_numbers<[1], [0], [0], [1], [0, 0, 1, 1], [], []>} : vector<8x128xf32>, vector<128x128xf32>, vector<8x128xf32> -> vector<8x128xf32>
    %7 = arith.addf %3, %6 : vector<8x128xf32>
    %c0_6 = arith.constant 0 : index
    %c0_7 = arith.constant 0 : index
    %8 = vector.load %arg7[%c0_6, %c0_7] : memref<8x128xf32, #tpu.memory_space<vmem>>, vector<8x128xf32>
    tpu.vector_store %arg7[%c0_6, %c0_7], %7 {strides = array<i32>} : memref<8x128xf32, #tpu.memory_space<vmem>>, vector<8x128xf32>,
    %c0_i32_8 = arith.constant 0 : i32
    %9 = arith.cmpi eq, %arg2, %c0_i32_8 : i32
    %10 = arith.extui %9 : i1 to i32
    %c0_i32_9 = arith.constant 0 : i32
    %11 = arith.cmpi ne, %10, %c0_i32_9 : i32
    scf.if %11 {
      %c0_10 = arith.constant 0 : index
      %c0_11 = arith.constant 0 : index
      %12 = vector.load %arg7[%c0_10, %c0_11] : memref<8x128xf32, #tpu.memory_space<vmem>>, vector<8x128xf32>
      %c0_12 = arith.constant 0 : index
      %c0_13 = arith.constant 0 : index
      %13 = vector.load %arg5[%c0_12, %c0_13] : memref<1x128xf32, #tpu.memory_space<vmem>>, vector<1x128xf32>
      %14 = vector.broadcast %13 : vector<1x128xf32> to vector<8x128xf32>
      %15 = arith.addf %12, %14 : vector<8x128xf32>
      %c0_14 = arith.constant 0 : index
      %c0_15 = arith.constant 0 : index
      %16 = vector.load %arg6[%c0_14, %c0_15] : memref<8x128xf32, #tpu.memory_space<vmem>>, vector<8x128xf32>
      tpu.vector_store %arg6[%c0_14, %c0_15], %15 {strides = array<i32>} : memref<8x128xf32, #tpu.memory_space<vmem>>, vector<8x128xf32>,
    } else {
    }
    return
  }
  func.func @transform_0(%arg0: i32, %arg1: i32, %arg2: i32) -> (i32, i32) {
    %c0_i32 = arith.constant 0 : i32
    return %arg0, %arg2 : i32, i32
  }
  func.func @transform_1(%arg0: i32, %arg1: i32, %arg2: i32) -> (i32, i32) {
    %c0_i32 = arith.constant 0 : i32
    return %arg2, %arg1 : i32, i32
  }
  func.func @transform_2(%arg0: i32, %arg1: i32, %arg2: i32) -> (i32, i32) {
    %c0_i32 = arith.constant 0 : i32
    %c0_i32_0 = arith.constant 0 : i32
    return %c0_i32, %arg1 : i32, i32
  }
  func.func @transform_3(%arg0: i32, %arg1: i32, %arg2: i32) -> (i32, i32) {
    %c0_i32 = arith.constant 0 : i32
    return %arg0, %arg1 : i32, i32
  }
}

</mosaic_0001>

<bundles_post_ra>
// kernel: classifier_forward.1
= control target key start
LH: loop header
LB: loop body
LE: loop exit
PB: predicated region body
PF: predicated region fallthrough
CT: control target
= control target key end

     0   :  { %s192_s0 = inlined_call_operand.vmem [shape: f32[8,128], index: 0, kind: input, shape index: {}]   ;;  %s193_s1 = inlined_call_operand.vmem [shape: f32[128,128], index: 1, kind: input, shape index: {}]   ;;  %s194_s2 = inlined_call_operand.vmem [shape: f32[1,128], index: 2, kind: input, shape index: {}]   ;;  %s195_s3 = inlined_call_operand.hbm [shape: f32[8,128], index: 3, kind: output, shape index: {}]  }
   0x1   :  { %v37_v0 = vld [vmem:[%s193_s1 + $0x78] sm:$0xff]  ;;  %v36_v1 = vld [vmem:[%s193_s1 + $0x70] sm:$0xff]  ;;  %v35_v2 = vld [vmem:[%s193_s1 + $0x68] sm:$0xff] }
   0x2   :  { %38 = vmatpush.msra.mxu0 %v37_v0  ;;  %v34_v3 = vld [vmem:[%s193_s1 + $0x60] sm:$0xff]  ;;  %v33_v4 = vld [vmem:[%s193_s1 + $0x58] sm:$0xff] }
   0x4   :  { %39 = vmatpush.msra.mxu0 %v36_v1 }
   0x6   :  { %40 = vmatpush.msra.mxu0 %v35_v2 }
   0x7   :  { %8 = vsyncpa [#allocation4], 0  ;;  %v32_v5 = vld [vmem:[%s193_s1 + $0x50] sm:$0xff]  ;;  %v31_v6 = vld [vmem:[%s193_s1 + $0x48] sm:$0xff]  ;;  %s114_s21 = smov [#allocation3]   ;;  %s77_s25 = sshll.u32 %s195_s3, 4  ;;  %s78_s25 = int_to_ptr.hbm [resolvable:$true] %s77_s25 }
   0x8   :  { %41 = vmatpush.msra.mxu0 %v34_v3  ;;  %v30_v7 = vld [vmem:[%s193_s1 + $0x40] sm:$0xff]  ;;  %v29_v8 = vld [vmem:[%s193_s1 + $0x38] sm:$0xff]  ;;  %v28_v9 = vld [vmem:[%s193_s1 + $0x30] sm:$0xff]  ;;  %s75_s22 = sshll.u32 %s114_s21, 4  ;;  %s76_s22 = int_to_ptr.vmem [resolvable:$true] %s75_s22 }
   0x9   :  { %v27_v10 = vld [vmem:[%s193_s1 + $0x28] sm:$0xff]  ;;  %v26_v11 = vld [vmem:[%s193_s1 + $0x20] sm:$0xff]  ;;  %v25_v12 = vld [vmem:[%s193_s1 + $0x18] sm:$0xff] }
   0xa   :  { %42 = vmatpush.msra.mxu0 %v33_v4  ;;  %v24_v13 = vld [vmem:[%s193_s1 + $0x10] sm:$0xff]  ;;  %v23_v14 = vld [vmem:[%s193_s1 + $0x8] sm:$0xff]  ;;  %v22_v15 = vld [vmem:[%s193_s1] sm:$0xff] }
   0xb   :  { %v21_v16 = vld [vmem:[%s192_s0] sm:$0xff] }
   0xc   :  { %43 = vmatpush.msra.mxu0 %v32_v5  ;;  %v87_v17 = vld [vmem:[%s194_s2] ss:$0 sm:$0xff] }
   0xe   :  { %44 = vmatpush.msra.mxu0 %v31_v6 }
  0x10   :  { %45 = vmatpush.msra.mxu0 %v30_v7 }
  0x12   :  { %46 = vmatpush.msra.mxu0 %v29_v8 }
  0x14   :  { %47 = vmatpush.msra.mxu0 %v28_v9 }
  0x16   :  { %48 = vmatpush.msra.mxu0 %v27_v10 }
  0x18   :  { %49 = vmatpush.msra.mxu0 %v26_v11 }
  0x1a   :  { %50 = vmatpush.msra.mxu0 %v25_v12 }
  0x1c   :  { %51 = vmatpush.msra.mxu0 %v24_v13 }
  0x1e   :  { %52 = vmatpush.msra.mxu0 %v23_v14 }
  0x20   :  { %53 = vmatpush.msra.mxu0 %v22_v15 }
  0x21   :  { %54 = vmatmul.f32.vlgmr.msra.gmra.mxu0 %v21_v16 }
  0x9e   :  { %v55_v18 = vpop.f32.mrf.mxu0 }
  0x9f   :  { %v68_v19 = vadd.f32 %v87_v17, %v55_v18 }
  0xa1   :  { %69 = vst [vmem:[#allocation3] sm:$0xff] %v68_v19 }
  0xa2   :  { %80 = dma.vmem_to_hbm [thread:$0]  %s76_s22, 128, %s78_s25, [#allocation4]  }
  0xa3   :  { %112 = dma.done.wait [#allocation4], 128  }
  0xa4   :  { %113 = vsyncadd [#allocation4], 4294967168 }
  0xa5   :  { %85 = vsyncpa [#allocation4], 1 }

</bundles_post_ra>
